<compile_context>
chip_gen: v7x
topology: tpu7x:2x2x1
jax: 0.10.0
libtpu: 0.0.40
codegen_flags: <defaults>
</compile_context>

<pallas_src>
import jax
import jax.numpy as jnp
from jax import lax
from jax.experimental import pallas as pl
from jax.experimental.pallas import tpu as pltpu


def edge_mlp_kernel(idx_ref, ab_ref, w2_ref, b2_ref, out_ref):
    # Per grid step:
    #   idx_ref : (2, TE)   int32 edge endpoints (row in sublane 0, col in 1)
    #   ab_ref  : (F, 2N)   pre-transformed node features [W1a^T x^T + b1 | W1b^T x^T]
    #   w2_ref  : (F, 1)    second-layer weights (f32)
    #   b2_ref  : (1, 1)    second-layer bias (f32)
    #   out_ref : (1, TE)   lane-dense sigmoid output (f32)
    two_n = ab_ref.shape[1]
    n = two_n // 2
    te = idx_ref.shape[1]

    # Stacked one-hot gather matrix, built once per tile on the VPU:
    #   column e has a 1 at position row[e] (top half) and N + col[e] (bottom).
    node_iota = lax.broadcasted_iota(jnp.int32, (two_n, te), 0)       # (2N, TE)
    row_ids = idx_ref[0:1, :]                                         # (1, TE)
    col_ids = idx_ref[1:2, :] + n                                     # (1, TE)
    target = jnp.where(node_iota < n, row_ids, col_ids)               # (2N, TE)
    onehot = (node_iota == target).astype(ab_ref.dtype)               # (2N, TE)

    # Single MXU matmul: gather + first linear layer (+ b1, already folded).
    h = jnp.dot(ab_ref[...], onehot,
                preferred_element_type=jnp.float32)                   # (F, TE)
    h = jnp.maximum(h, 0.0)

    # Second layer (F -> 1): VPU multiply + sublane reduce, stays lane-dense.
    o = jnp.sum(h * w2_ref[...], axis=0, keepdims=True) + b2_ref[...] # (1, TE)
    out_ref[...] = jax.nn.sigmoid(o).astype(out_ref.dtype)


def dynamic_edge_conv(x, edge_index, w1, b1, w2, b2, *,
                      tile_e=None, gather_dtype=jnp.bfloat16):
    """x: [N, F] float32, edge_index: [2, E] int32.
    w1: [2F, F], b1: [F], w2: [F, 1], b2: [1]  (x @ W layout).
    Returns sigmoid(MLP(cat([x[row], x[col]], -1))) of shape [E, 1]."""
    N, F = x.shape
    E = edge_index.shape[1]

    if tile_e is None:
        # Big lane tiles amortize the ~600-cycle per-grid-step overhead, but
        # keep >= 2 grid steps so v7x's two TensorCores both get edge tiles.
        tile_e = 2048
        while tile_e > 256 and pl.cdiv(E, tile_e) < 2:
            tile_e //= 2
    num_tiles = pl.cdiv(E, tile_e)
    e_pad = num_tiles * tile_e
    pad = e_pad - E

    # Pack row/col into one (2, E_pad) operand; pad with node 0 (valid index),
    # padded lanes are sliced away below.
    idx_p = jnp.pad(edge_index.astype(jnp.int32), ((0, 0), (0, pad)))

    # Fold W1 (and b1, row-half only) into the node features in f32, then cast
    # the resident gather operand to the requested MXU dtype.
    xt = x.T.astype(jnp.float32)                                        # (F, N)
    a = (jnp.dot(w1[:F].T, xt, precision=lax.Precision.HIGHEST)
         + b1.reshape(F, 1))                                            # (F, N)
    b = jnp.dot(w1[F:].T, xt, precision=lax.Precision.HIGHEST)          # (F, N)
    ab = jnp.concatenate([a, b], axis=1).astype(gather_dtype)           # (F, 2N)

    w2_c = w2.reshape(F, 1).astype(jnp.float32)
    b2_c = b2.reshape(1, 1).astype(jnp.float32)

    out2d = pl.pallas_call(
        edge_mlp_kernel,
        out_shape=jax.ShapeDtypeStruct((1, e_pad), jnp.float32),
        grid_spec=pltpu.PrefetchScalarGridSpec(
            num_scalar_prefetch=0,
            grid=(num_tiles,),
            in_specs=[
                pl.BlockSpec((2, tile_e), lambda i: (0, i)),    # edge ids
                pl.BlockSpec((F, 2 * N), lambda i: (0, 0)),     # [A|B] resident
                pl.BlockSpec((F, 1), lambda i: (0, 0)),         # w2
                pl.BlockSpec((1, 1), lambda i: (0, 0)),         # b2
            ],
            out_specs=pl.BlockSpec((1, tile_e), lambda i: (0, i)),
        ),
        compiler_params=pltpu.CompilerParams(
            dimension_semantics=("parallel",),
            vmem_limit_bytes=32 * 1024 * 1024),
    )(idx_p, ab, w2_c, b2_c)

    return out2d[0, :E].reshape(E, 1)


def reference(x, edge_index, w1, b1, w2, b2):
    row, col = edge_index[0], edge_index[1]
    ef = jnp.concatenate([x[row], x[col]], axis=1)
    h = jnp.maximum(
        jnp.dot(ef, w1, precision=lax.Precision.HIGHEST) + b1, 0.0)
    return jax.nn.sigmoid(
        jnp.dot(h, w2, precision=lax.Precision.HIGHEST) + b2)


if __name__ == "__main__":
    feat_dim = 32          # F
    num_nodes = 64         # N
    num_edges = 1000       # E (deliberately NOT a multiple of the tile)

    key = jax.random.PRNGKey(0)
    kx, ke, kw1, kb1, kw2, kb2 = jax.random.split(key, 6)

    x = jax.random.normal(kx, (num_nodes, feat_dim), dtype=jnp.float32)
    edge_index = jax.random.randint(ke, (2, num_edges), 0, num_nodes,
                                    dtype=jnp.int32)

    # Linear(2F -> F), Linear(F -> 1) in "x @ W" layout (transpose of
    # PyTorch's [out, in]).
    w1 = (jax.random.normal(kw1, (2 * feat_dim, feat_dim), dtype=jnp.float32)
          * 0.1)
    b1 = jax.random.normal(kb1, (feat_dim,), dtype=jnp.float32) * 0.1
    w2 = jax.random.normal(kw2, (feat_dim, 1), dtype=jnp.float32) * 0.1
    b2 = jax.random.normal(kb2, (1,), dtype=jnp.float32) * 0.1

    ref = reference(x, edge_index, w1, b1, w2, b2)

    # Strict f32 validation path.
    out_f32 = dynamic_edge_conv(x, edge_index, w1, b1, w2, b2,
                                gather_dtype=jnp.float32)
    out_f32 = jax.block_until_ready(out_f32)
    assert out_f32.shape == (num_edges, 1)
    assert jnp.allclose(out_f32, ref, atol=1e-5, rtol=1e-5), "f32 mismatch"

    # Default bf16 gather path (MXU-native on v6e/v7x); bf16 rounding of the
    # pre-transformed features warrants a looser tolerance.
    out_bf16 = dynamic_edge_conv(x, edge_index, w1, b1, w2, b2)
    out_bf16 = jax.block_until_ready(out_bf16)
    assert out_bf16.shape == (num_edges, 1)
    assert jnp.allclose(out_bf16, ref, atol=2e-2, rtol=2e-2), "bf16 mismatch"

    print("KERNEL_OK")
</pallas_src>

<mosaic_0001>
module attributes {stable_mosaic.version = 11 : i64} {
  func.func @edge_mlp_kernel(%arg0: i32, %arg1: memref<2x512xi32, #tpu.memory_space<vmem>>, %arg2: memref<32x128xf32, #tpu.memory_space<vmem>>, %arg3: memref<32x1xf32, #tpu.memory_space<vmem>>, %arg4: memref<1x1xf32, #tpu.memory_space<vmem>>, %arg5: memref<1x512xf32, #tpu.memory_space<vmem>>) attributes {dimension_semantics = [#tpu.dimension_semantics<parallel>], iteration_bounds = array<i64: 2>, scalar_prefetch = 0 : i64, scratch_operands = 0 : i64, tpu.core_type = #tpu.core_type<tc>, window_params = [{transform_indices = @transform_0, window_bounds = array<i64: 2, 512>}, {pipeline_mode = #tpu.pipeline_mode<synchronous>, transform_indices = @transform_1, window_bounds = array<i64: 32, 128>}, {pipeline_mode = #tpu.pipeline_mode<synchronous>, transform_indices = @transform_2, window_bounds = array<i64: 32, 1>}, {pipeline_mode = #tpu.pipeline_mode<synchronous>, transform_indices = @transform_3, window_bounds = array<i64: 1, 1>}, {transform_indices = @transform_4, window_bounds = array<i64: 1, 512>}]} {
    %0 = tpu.iota {dimensions = array<i32: 0>} : vector<128x512xi32>
    %c0 = arith.constant 0 : index
    %c0_0 = arith.constant 0 : index
    %1 = vector.load %arg1[%c0, %c0_0] : memref<2x512xi32, #tpu.memory_space<vmem>>, vector<1x512xi32>
    %c1 = arith.constant 1 : index
    %c0_1 = arith.constant 0 : index
    %2 = vector.load %arg1[%c1, %c0_1] : memref<2x512xi32, #tpu.memory_space<vmem>>, vector<1x512xi32>
    %c64_i32 = arith.constant 64 : i32
    %3 = vector.broadcast %c64_i32 : i32 to vector<1x512xi32>
    %4 = arith.addi %2, %3 : vector<1x512xi32>
    %c64_i32_2 = arith.constant 64 : i32
    %5 = vector.broadcast %c64_i32_2 : i32 to vector<128x512xi32>
    %6 = arith.cmpi slt, %0, %5 : vector<128x512xi32>
    %7 = vector.shape_cast %1 : vector<1x512xi32> to vector<1x512xi32>
    %8 = vector.broadcast %7 : vector<1x512xi32> to vector<128x512xi32>
    %9 = vector.shape_cast %4 : vector<1x512xi32> to vector<1x512xi32>
    %10 = vector.broadcast %9 : vector<1x512xi32> to vector<128x512xi32>
    %11 = arith.select %6, %8, %10 : vector<128x512xi1>, vector<128x512xi32>
    %12 = arith.cmpi eq, %0, %11 : vector<128x512xi32>
    %13 = arith.extui %12 : vector<128x512xi1> to vector<128x512xi32>
    %14 = arith.sitofp %13 : vector<128x512xi32> to vector<128x512xf32>
    %c0_3 = arith.constant 0 : index
    %c0_4 = arith.constant 0 : index
    %15 = vector.load %arg2[%c0_3, %c0_4] : memref<32x128xf32, #tpu.memory_space<vmem>>, vector<32x128xf32>
    %cst = arith.constant dense<0.000000e+00> : vector<32x512xf32>
    %16 = tpu.matmul %15, %14, %cst {dimension_numbers = #tpu.dot_dimension_numbers<[1], [0], [0], [1], [0, 0, 1, 1], [], []>} : vector<32x128xf32>, vector<128x512xf32>, vector<32x512xf32> -> vector<32x512xf32>
    %cst_5 = arith.constant 0.000000e+00 : f32
    %17 = vector.broadcast %cst_5 : f32 to vector<32x512xf32>
    %18 = arith.maximumf %16, %17 : vector<32x512xf32>
    %c0_6 = arith.constant 0 : index
    %c0_7 = arith.constant 0 : index
    %19 = vector.load %arg3[%c0_6, %c0_7] : memref<32x1xf32, #tpu.memory_space<vmem>>, vector<32x1xf32>
    %20 = vector.broadcast %19 : vector<32x1xf32> to vector<32x512xf32>
    %21 = arith.mulf %18, %20 : vector<32x512xf32>
    %cst_8 = arith.constant dense<0.000000e+00> : vector<512xf32>
    %22 = vector.multi_reduction <add>, %21, %cst_8 [0] : vector<32x512xf32> to vector<512xf32>
    %23 = vector.shape_cast %22 : vector<512xf32> to vector<1x512xf32>
    %c0_9 = arith.constant 0 : index
    %c0_10 = arith.constant 0 : index
    %24 = vector.load %arg4[%c0_9, %c0_10] : memref<1x1xf32, #tpu.memory_space<vmem>>, vector<1x1xf32>
    %25 = vector.broadcast %24 : vector<1x1xf32> to vector<1x512xf32>
    %26 = arith.addf %23, %25 : vector<1x512xf32>
    %27 = arith.negf %26 : vector<1x512xf32>
    %28 = math.exp %27 : vector<1x512xf32>
    %cst_11 = arith.constant 1.000000e+00 : f32
    %29 = vector.broadcast %cst_11 : f32 to vector<1x512xf32>
    %30 = arith.addf %29, %28 : vector<1x512xf32>
    %31 = arith.divf %29, %30 : vector<1x512xf32>
    %c0_12 = arith.constant 0 : index
    %c0_13 = arith.constant 0 : index
    %32 = vector.load %arg5[%c0_12, %c0_13] : memref<1x512xf32, #tpu.memory_space<vmem>>, vector<1x512xf32>
    tpu.vector_store %arg5[%c0_12, %c0_13], %31 {strides = array<i32>} : memref<1x512xf32, #tpu.memory_space<vmem>>, vector<1x512xf32>,
    return
  }
  func.func @transform_0(%arg0: i32) -> (i32, i32) {
    %c0_i32 = arith.constant 0 : i32
    %c0_i32_0 = arith.constant 0 : i32
    return %c0_i32, %arg0 : i32, i32
  }
  func.func @transform_1(%arg0: i32) -> (i32, i32) {
    %c0_i32 = arith.constant 0 : i32
    %c0_i32_0 = arith.constant 0 : i32
    %c0_i32_1 = arith.constant 0 : i32
    return %c0_i32, %c0_i32_0 : i32, i32
  }
  func.func @transform_2(%arg0: i32) -> (i32, i32) {
    %c0_i32 = arith.constant 0 : i32
    %c0_i32_0 = arith.constant 0 : i32
    %c0_i32_1 = arith.constant 0 : i32
    return %c0_i32, %c0_i32_0 : i32, i32
  }
  func.func @transform_3(%arg0: i32) -> (i32, i32) {
    %c0_i32 = arith.constant 0 : i32
    %c0_i32_0 = arith.constant 0 : i32
    %c0_i32_1 = arith.constant 0 : i32
    return %c0_i32, %c0_i32_0 : i32, i32
  }
  func.func @transform_4(%arg0: i32) -> (i32, i32) {
    %c0_i32 = arith.constant 0 : i32
    %c0_i32_0 = arith.constant 0 : i32
    return %c0_i32, %arg0 : i32, i32
  }
}

</mosaic_0001>

<bundles_post_ra>
// kernel: tpu_custom_call.1
= control target key start
LH: loop header
LB: loop body
LE: loop exit
PB: predicated region body
PF: predicated region fallthrough
CT: control target
= control target key end

     0   :  { %s1775_s0 = inlined_call_operand.hbm [shape: s32[2,1024], index: 0, kind: input, shape index: {}]   ;;  %s1776_s1 = inlined_call_operand.vmem [shape: f32[32,128], index: 1, kind: input, shape index: {}]   ;;  %s1777_s2 = inlined_call_operand.vmem [shape: f32[32,1], index: 2, kind: input, shape index: {}]   ;;  %s1778_s3 = inlined_call_operand.<no memory space> [shape: f32[1,1], index: 3, kind: input, shape index: {}]   ;;  %s1779_s4 = inlined_call_operand.hbm [shape: f32[1,1024], index: 4, kind: output, shape index: {}]  }
   0x1   :  { %v9_v0 = vstv %s1778_s3 }
   0x2   :  { %10 = vst [vmem:[#allocation2] sm:$0x1] %v9_v0 }
   0x3   :  { %11 = vsyncpa [#allocation4], 0 }
   0x4   :  { %13 = vsyncpa [#allocation4 + $0x1], 0 }
   0x5   :  { %14 = vsyncpa [#allocation5], 0 }
   0x6   :  { %16 = vsyncpa [#allocation5 + $0x1], 0  ;;  %s1387_s17 = smov 0   ;;  %s1389_s18 = smov 0  }
   0x7   :  { %s1391_s19 = smov 0   ;;  %s1393_s20 = smov 0  }
   0x8 LB: > { %s1408_s3 = sadd.s32 4294967295, %s1351_s20   ;;  %s974_s21 = sadd.s32 4294967294, %s1351_s20   ;;  %s1351_s20 = sphi %s1393_s20, %s1794_s20   ;;  %s1347_s19 = sphi %s1391_s19, %s1793_s19   ;;  %s1343_s18 = sphi %s1389_s18, %s1792_s18   ;;  %s1339_s17 = sphi %s1387_s17, %s1791_s17  }
   0x9   : > { %s1412_s22 = sadd.s32 1, %s1351_s20   ;;  %s29_s23 = sadd.s32 1, %s1347_s19 }
   0xa   : > { %s26_s24 = ssub.s32 %s1351_s20, %s1412_s22  ;;  %p36_p0 = scmp.ne.s32.totalorder %s1347_s19, %s1343_s18 }
   0xb   : > { %p27_p1 = scmp.eq.s32.totalorder %s26_s24, 0  ;;  %p37_p2 = scmp.eq.s32.totalorder %s1351_s20, 0 }
   0xc   : > { %p42_p3 = scmp.ne.s32.totalorder %s1343_s18, %s1339_s17  ;;  %p43_p4 = scmp.eq.s32.totalorder %s1408_s3, 0 }
   0xd   : > { %s1424_s25 = scalar_select %p27_p1, %s1347_s19, %s29_s23  }
   0xe   : > { %p1426_p5 = por %p37_p2, %p36_p0  ;;  %p1430_p6 = por %p43_p4, %p42_p3 }
   0xf   : > { %p129_p7 = scmp.eq.s32.totalorder %s1408_s3, 1  ;;  %p135_p8 = scmp.eq.s32.totalorder %s974_s21, 1 }
  0x10   : > { %p1199_p10 = scmp.lt.s32.totalorder %s1351_s20, 2  ;;  %s164_s30 = sand.u32 1, %s1347_s19  }
  0x11   : > { %p1437_p11 = por %p129_p7, %p36_p0  ;;  %p1441_p12 = por %p135_p8, %p42_p3 }
  0x12   : > { %s1121_s5 = sshll.u32 %s1351_s20, 7  ;;  %s977_s6 = sshll.u32 %s164_s30, 3 }
  0x13   : > { %s1783_s28 = scalar_select %p1437_p11, 1, 0 }
  0x14   : > { %s1784_s29 = scalar_select %p1441_p12, 1, 0 }
  0x15   : > { %s1450_s9 = scalar_lea.hbm %s1775_s0, %s1121_s5  ;;  %s168_s10 = scalar_lea.vmem [#allocation3], %s977_s6 }
  0x16   : > { %s176_s11 = sshll.u32 %s168_s10, 4  ;;  %p1454_p13 = pnand %p1199_p10, %p1426_p5  ;;  %s1458_s11 = int_to_ptr.vmem [resolvable:$true] %s176_s11 }
  0x17   : > { %s165_s13 = scalar_lea.sflag [#allocation4], %s164_s30  ;;  %s1255_s14 = scalar_lea.hbm %s1450_s9, 128 }
  0x18   : > { %p1256_p2 = scmp.ne.s32.totalorder %s1450_s9, %s1255_s14  ;;  %p1257_p3 = pneg %p1454_p13 }
  0x19   : > { %s1260_s21 = scalar_lea.hbm %s1775_s0, 256  ;;  %p1261_p5 = scmp.lt.u32.totalorder %s1450_s9, %s1775_s0 }
  0x1a   : > { %p1258_p4 = pnand %p1257_p3, %p1256_p2  ;;  %p1262_p8 = scmp.lt.u32.totalorder %s1260_s21, %s1255_s14 }
  0x1b   : > { %p1264_p9 = scmp.lt.u32.totalorder %s1255_s14, %s1450_s9 }
  0x1c   : > { %p1259_p7 = pneg %p1258_p4  ;;  %p1263_p10 = por %p1262_p8, %p1261_p5 }
  0x1e   : > { %p1265_p0 = por %p1264_p9, %p1263_p10 }
  0x20   : > { %p1266_p1 = pnand %p1265_p0, %p1259_p7 }
  0x22   : > { %1269 = shalt.err (!%p1266_p1)
}
  0x23   : > { %s1270_s26 = scalar_lea.vmem %s1458_s11, 128  ;;  %s1353_s30 = smov [#allocation3]  }
  0x24   : > { %p1271_p2 = scmp.ne.s32.totalorder %s1458_s11, %s1270_s26  ;;  %s1275_s5 = sshll.u32 %s1353_s30, 4  ;;  %s1276_s5 = int_to_ptr.vmem [resolvable:$false] %s1275_s5 }
  0x25   : > { %s1277_s6 = scalar_lea.vmem %s1276_s5, 256  ;;  %p1278_p11 = scmp.lt.s32.totalorder %s1458_s11, %s1276_s5 }
  0x26   : > { %p1273_p4 = pnand %p1271_p2, %p1257_p3  ;;  %p1279_p5 = scmp.lt.s32.totalorder %s1277_s6, %s1270_s26 }
  0x28   : > { %p1274_p12 = pneg %p1273_p4  ;;  %p1280_p8 = por %p1279_p5, %p1278_p11 }
  0x2a   : > { %p1281_p9 = pnand %p1280_p8, %p1274_p12 }
  0x2c   : > { %1284 = shalt.err (!%p1281_p9)
}
  0x2d   : > { %1194 = dma.hbm_to_vmem [thread:$0]  (!%p1454_p13), %s1450_s9, 128, %s1458_s11, %s165_s13  }
  0x2e   : > { %p1786_p0 = scmp.lt.s32.totalorder %s1351_s20, 3  ;;  %p1787_p1 = scmp.ge.s32.totalorder %s1351_s20, 1 }
  0x30   : > { %p182_p3 = pnand %p1787_p1, %p1786_p0 }
  0x31   : > { %s1492_s7 = sand.u32 (!%p182_p3), 1, %s1343_s18  }
  0x32   : > { %185 = sbr.rel (%p182_p3) target bundleno = 396 (0x18c), region = 36  ;;  %s981_s8 = sshll.u32 (!%p182_p3), %s1492_s7, 3 }
  0x33   : > { %s188_s10 = scalar_lea.sflag (!%p182_p3), [#allocation4], %s1492_s7  ;;  %s1496_s14 = scalar_lea.vmem (!%p182_p3), [#allocation3], %s981_s8 }
  0x39   : > { %1330 = dma.done.wait (%p1430_p6), %s188_s10, 128  }
  0x3a   : > { %1332 = vsyncadd (%p1430_p6), %s188_s10, 4294967168  ;;  %v218_v1 = vlaneseq  ;;  %v1354_v2 = vmov 0.0   ;;  %v1355_v4 = vmov 0   ;;  %v235_v10 = vld [vmem:[%s1496_s14] ss:$2 sm:$0xf] }
  0x3b   : > { %611 = vmatprep.mubr.f32.mxu0 %v1354_v2  ;;  %700 = vmatprep.mubr.f32.mxu1 %v1354_v2  ;;  %v741_v17 = vld [vmem:[%s1777_s2] sm:$0xff]  ;;  %v1356_v18 = vmov 1.0|1.0   ;;  %v742_v25 = vld [vmem:[%s1777_s2 + $0x8] sm:$0xff]  ;;  %v743_v34 = vld [vmem:[%s1777_s2 + $0x10] sm:$0xff]  ;;  %s1122_s27 = sshll.u32 %s1408_s3, 6 }
  0x3c   : > { %v1505_v3 = vshrl.u32 %v218_v1, 7  ;;  %1237 = vset.pattern.permute.xlu0 %v1355_v4  ;;  %1238 = vset.pattern.permute.xlu1 %v1355_v4  ;;  %v983_v21 = vld [vmem:[%s1496_s14 + $0x1] ss:$2 sm:$0xf]  ;;  %v817_v35 = vld [vmem:[#allocation2] sm:$0x1]  ;;  %s1731_s15 = scalar_lea.hbm %s1779_s4, %s1122_s27 }
  0x3d   : > { %747 = vperm.xlu0 %1237, %v741_v17   ;;  %v238_v24 = vadd.s32 64, %v983_v21  ;;  %757 = vperm.xlu1 %1238, %v743_v34   ;;  %v744_v38 = vld [vmem:[%s1777_s2 + $0x18] sm:$0xff]  ;;  %v543_v41 = vld [vmem:[%s1776_s1] sm:$0xff]  ;;  %v544_v42 = vld [vmem:[%s1776_s1 + $0x8] sm:$0xff]  ;;  %s982_s14 = sshll.u32 %s1492_s7, 2  ;;  %s890_s16 = scalar_lea.sflag [#allocation5], %s1492_s7 }
  0x3e   : > { %v261_v5 = vsub.s32 1, %v1505_v3  ;;  %v269_v6 = vsub.s32 3, %v1505_v3  ;;  %v1510_v7 = vsub.s32 0, %v1505_v3  ;;  %v265_v8 = vsub.s32 2, %v1505_v3  ;;  %v545_v43 = vld [vmem:[%s1776_s1 + $0x10] sm:$0xff]  ;;  %v546_v44 = vld [vmem:[%s1776_s1 + $0x18] sm:$0xff] }
  0x3f   : > { %v220_v9 = vadd.s32 8, %v1505_v3  ;;  %v221_v11 = vadd.s32 16, %v1505_v3  ;;  %v222_v12 = vadd.s32 24, %v1505_v3  ;;  %v223_v19 = vadd.s32 32, %v1505_v3  ;;  %s215_s9 = scalar_lea.vmem [#allocation6], %s982_s14  ;;  %p1788_p11 = scmp.ne.s32.totalorder %s1783_s28, 0 }
  0x40   : > { %v1519_v13 = vrot.slane %v235_v10, %v261_v5  ;;  %v1523_v14 = vrot.slane %v235_v10, %v269_v6  ;;  %v1526_v15 = vrot.slane %v235_v10, %v1510_v7  ;;  %v1530_v16 = vrot.slane %v235_v10, %v265_v8  ;;  %s904_s11 = sshll.u32 %s215_s9, 4  ;;  %s1358_s3 = smov [#allocation6]   ;;  %s1733_s11 = int_to_ptr.vmem [resolvable:$true] %s904_s11 }
  0x41   : > { %v224_v20 = vadd.s32 40, %v1505_v3  ;;  %v225_v22 = vadd.s32 48, %v1505_v3  ;;  %v226_v23 = vadd.s32 56, %v1505_v3  ;;  %v227_v26 = vadd.s32 64, %v1505_v3  ;;  %752 = vperm.xlu0 %1237, %v742_v25   ;;  %762 = vperm.xlu1 %1238, %v744_v38   ;;  %s1285_s21 = scalar_lea.vmem %s1733_s11, 64  ;;  %s1289_s23 = sshll.u32 %s1358_s3, 4  ;;  %s1290_s23 = int_to_ptr.vmem [resolvable:$false] %s1289_s23 }
  0x42   : > { %vm352_vm0 = vcmp.eq.s32.totalorder %v1505_v3, %v1519_v13  ;;  %vm356_vm1 = vcmp.eq.s32.totalorder %v220_v9, %v1519_v13  ;;  %vm354_vm2 = vcmp.eq.s32.totalorder %v1505_v3, %v1523_v14  ;;  %vm358_vm3 = vcmp.eq.s32.totalorder %v220_v9, %v1523_v14  ;;  %p1286_p6 = scmp.ne.s32.totalorder %s1733_s11, %s1285_s21  ;;  %s1291_s24 = scalar_lea.vmem %s1290_s23, 128 }
  0x43   : > { %vm1123_vm4 = vmpackc.low %vm356_vm1, %vm352_vm0  ;;  %vm351_vm5 = vcmp.eq.s32.totalorder %v1505_v3, %v1526_v15  ;;  %vm355_vm6 = vcmp.eq.s32.totalorder %v220_v9, %v1526_v15  ;;  %vm353_vm7 = vcmp.eq.s32.totalorder %v1505_v3, %v1530_v16  ;;  %vm357_vm8 = vcmp.eq.s32.totalorder %v220_v9, %v1530_v16  ;;  %p1292_p7 = scmp.lt.s32.totalorder %s1733_s11, %s1290_s23  ;;  %p1293_p10 = scmp.lt.s32.totalorder %s1291_s24, %s1285_s21 }
  0x44   : > { %1124 = vmatprep.subr.msk.bf16.mxu0 %vm1123_vm4, %v1356_v18  ;;  %vm1155_vm9 = vmpackc.low %vm358_vm3, %vm354_vm2  ;;  %vm360_vm10 = vcmp.eq.s32.totalorder %v221_v11, %v1519_v13  ;;  %vm364_vm11 = vcmp.eq.s32.totalorder %v222_v12, %v1519_v13  ;;  %vm362_vm13 = vcmp.eq.s32.totalorder %v221_v11, %v1523_v14  ;;  %vm366_vm14 = vcmp.eq.s32.totalorder %v222_v12, %v1523_v14  ;;  %p1287_p12 = pnand %p1286_p6, %p1788_p11 }
  0x45   : > { %1156 = vmatprep.subr.msk.bf16.mxu1 %vm1155_vm9, %v1356_v18  ;;  %vm1125_vm12 = vmpackc.low %vm355_vm6, %vm351_vm5  ;;  %vm359_vm0 = vcmp.eq.s32.totalorder %v221_v11, %v1526_v15  ;;  %vm363_vm1 = vcmp.eq.s32.totalorder %v222_v12, %v1526_v15  ;;  %vm361_vm3 = vcmp.eq.s32.totalorder %v221_v11, %v1530_v16  ;;  %vm365_vm4 = vcmp.eq.s32.totalorder %v222_v12, %v1530_v16  ;;  %p1294_p2 = por %p1293_p10, %p1292_p7 }
  0x46   : > { %1126 = vmatpush1.bf16.msk.msra.mxu0 %vm1125_vm12, %v1356_v18  ;;  %vm1157_vm15 = vmpackc.low %vm357_vm8, %vm353_vm7  ;;  %vm368_vm6 = vcmp.eq.s32.totalorder %v223_v19, %v1519_v13  ;;  %vm372_vm7 = vcmp.eq.s32.totalorder %v224_v20, %v1519_v13  ;;  %vm370_vm9 = vcmp.eq.s32.totalorder %v223_v19, %v1523_v14  ;;  %vm367_vm12 = vcmp.eq.s32.totalorder %v223_v19, %v1526_v15  ;;  %p1288_p13 = pneg %p1287_p12 }
  0x47   : > { %1158 = vmatpush1.bf16.msk.msra.mxu1 %vm1157_vm15, %v1356_v18  ;;  %vm1127_vm2 = vmpackc.low %vm364_vm11, %vm360_vm10  ;;  %vm374_vm10 = vcmp.eq.s32.totalorder %v224_v20, %v1523_v14  ;;  %vm369_vm15 = vcmp.eq.s32.totalorder %v223_v19, %v1530_v16  ;;  %v228_v27 = vadd.s32 72, %v1505_v3  ;;  %v1595_v28 = vrot.slane %v238_v24, %v261_v5  ;;  %820 = vperm.xlu0 %1237, %v817_v35  }
  0x48   : > { %1128 = vmatprep.subr.msk.bf16.mxu0 %vm1127_vm2, %v1356_v18  ;;  %vm1159_vm5 = vmpackc.low %vm366_vm14, %vm362_vm13  ;;  %vm371_vm13 = vcmp.eq.s32.totalorder %v224_v20, %v1526_v15  ;;  %vm376_vm2 = vcmp.eq.s32.totalorder %v225_v22, %v1519_v13  ;;  %v1604_v29 = vrot.slane %v238_v24, %v269_v6  ;;  %v1614_v30 = vrot.slane %v238_v24, %v1510_v7  ;;  %p1295_p4 = pnand %p1294_p2, %p1288_p13 }
  0x49   : > { %1160 = vmatprep.subr.msk.bf16.mxu1 %vm1159_vm5, %v1356_v18  ;;  %vm1129_vm8 = vmpackc.low %vm363_vm1, %vm359_vm0  ;;  %vm373_vm0 = vcmp.eq.s32.totalorder %v224_v20, %v1530_v16  ;;  %vm378_vm5 = vcmp.eq.s32.totalorder %v225_v22, %v1523_v14  ;;  %v1623_v31 = vrot.slane %v238_v24, %v265_v8  ;;  %v229_v32 = vadd.s32 80, %v1505_v3 }
  0x4a   : > { %1130 = vmatpush1.bf16.msk.msra.mxu0 %vm1129_vm8, %v1356_v18  ;;  %vm1161_vm11 = vmpackc.low %vm365_vm4, %vm361_vm3  ;;  %vm380_vm3 = vcmp.eq.s32.totalorder %v226_v23, %v1519_v13  ;;  %vm375_vm8 = vcmp.eq.s32.totalorder %v225_v22, %v1526_v15  ;;  %v230_v33 = vadd.s32 88, %v1505_v3  ;;  %v231_v36 = vadd.s32 96, %v1505_v3 }
  0x4b   : > { %1162 = vmatpush1.bf16.msk.msra.mxu1 %vm1161_vm11, %v1356_v18  ;;  %vm1131_vm14 = vmpackc.low %vm372_vm7, %vm368_vm6  ;;  %vm382_vm6 = vcmp.eq.s32.totalorder %v226_v23, %v1523_v14  ;;  %vm377_vm11 = vcmp.eq.s32.totalorder %v225_v22, %v1530_v16  ;;  %v232_v37 = vadd.s32 104, %v1505_v3  ;;  %v233_v39 = vadd.s32 112, %v1505_v3 }
  0x4c   : > { %1132 = vmatprep.subr.msk.bf16.mxu0 %vm1131_vm14, %v1356_v18  ;;  %vm1163_vm1 = vmpackc.low %vm374_vm10, %vm370_vm9  ;;  %vm379_vm9 = vcmp.eq.s32.totalorder %v226_v23, %v1526_v15  ;;  %vm384_vm14 = vcmp.eq.s32.totalorder %v227_v26, %v1595_v28  ;;  %v234_v40 = vadd.s32 120, %v1505_v3 }
  0x4d   : > { %1164 = vmatprep.subr.msk.bf16.mxu1 %vm1163_vm1, %v1356_v18  ;;  %vm1133_vm4 = vmpackc.low %vm371_vm13, %vm367_vm12  ;;  %vm381_vm12 = vcmp.eq.s32.totalorder %v226_v23, %v1530_v16  ;;  %vm386_vm1 = vcmp.eq.s32.totalorder %v227_v26, %v1604_v29 }
  0x4e   : > { %1134 = vmatpush1.bf16.msk.msra.mxu0 %vm1133_vm4, %v1356_v18  ;;  %vm1165_vm7 = vmpackc.low %vm373_vm0, %vm369_vm15  ;;  %vm388_vm15 = vcmp.eq.s32.totalorder %v228_v27, %v1595_v28  ;;  %vm383_vm4 = vcmp.eq.s32.totalorder %v227_v26, %v1614_v30 }
  0x4f   : > { %1166 = vmatpush1.bf16.msk.msra.mxu1 %vm1165_vm7, %v1356_v18  ;;  %vm1135_vm10 = vmpackc.low %vm380_vm3, %vm376_vm2  ;;  %vm390_vm2 = vcmp.eq.s32.totalorder %v228_v27, %v1604_v29  ;;  %vm385_vm7 = vcmp.eq.s32.totalorder %v227_v26, %v1623_v31 }
  0x50   : > { %1136 = vmatprep.subr.msk.bf16.mxu0 %vm1135_vm10, %v1356_v18  ;;  %vm1167_vm13 = vmpackc.low %vm382_vm6, %vm378_vm5  ;;  %vm387_vm5 = vcmp.eq.s32.totalorder %v228_v27, %v1614_v30  ;;  %vm392_vm10 = vcmp.eq.s32.totalorder %v229_v32, %v1595_v28 }
  0x51   : > { %1168 = vmatprep.subr.msk.bf16.mxu1 %vm1167_vm13, %v1356_v18  ;;  %vm1137_vm0 = vmpackc.low %vm379_vm9, %vm375_vm8  ;;  %vm389_vm8 = vcmp.eq.s32.totalorder %v228_v27, %v1623_v31  ;;  %vm394_vm13 = vcmp.eq.s32.totalorder %v229_v32, %v1604_v29 }
  0x52   : > { %1138 = vmatpush1.bf16.msk.msra.mxu0 %vm1137_vm0, %v1356_v18  ;;  %vm1169_vm3 = vmpackc.low %vm381_vm12, %vm377_vm11  ;;  %vm396_vm11 = vcmp.eq.s32.totalorder %v230_v33, %v1595_v28  ;;  %vm391_vm0 = vcmp.eq.s32.totalorder %v229_v32, %v1614_v30 }
  0x53   : > { %1170 = vmatpush1.bf16.msk.msra.mxu1 %vm1169_vm3, %v1356_v18  ;;  %vm1139_vm6 = vmpackc.low %vm388_vm15, %vm384_vm14  ;;  %vm398_vm14 = vcmp.eq.s32.totalorder %v230_v33, %v1604_v29  ;;  %vm393_vm3 = vcmp.eq.s32.totalorder %v229_v32, %v1623_v31 }
  0x54   : > { %1140 = vmatprep.subr.msk.bf16.mxu0 %vm1139_vm6, %v1356_v18  ;;  %vm1171_vm9 = vmpackc.low %vm390_vm2, %vm386_vm1  ;;  %vm395_vm1 = vcmp.eq.s32.totalorder %v230_v33, %v1614_v30  ;;  %vm400_vm6 = vcmp.eq.s32.totalorder %v231_v36, %v1595_v28 }
  0x55   : > { %1172 = vmatprep.subr.msk.bf16.mxu1 %vm1171_vm9, %v1356_v18  ;;  %vm1141_vm12 = vmpackc.low %vm387_vm5, %vm383_vm4  ;;  %vm397_vm4 = vcmp.eq.s32.totalorder %v230_v33, %v1623_v31  ;;  %vm402_vm9 = vcmp.eq.s32.totalorder %v231_v36, %v1604_v29 }
  0x56   : > { %1142 = vmatpush1.bf16.msk.msra.mxu0 %vm1141_vm12, %v1356_v18  ;;  %vm1173_vm15 = vmpackc.low %vm389_vm8, %vm385_vm7  ;;  %vm404_vm7 = vcmp.eq.s32.totalorder %v232_v37, %v1595_v28  ;;  %vm399_vm12 = vcmp.eq.s32.totalorder %v231_v36, %v1614_v30 }
  0x57   : > { %1174 = vmatpush1.bf16.msk.msra.mxu1 %vm1173_vm15, %v1356_v18  ;;  %vm1143_vm2 = vmpackc.low %vm396_vm11, %vm392_vm10  ;;  %vm406_vm10 = vcmp.eq.s32.totalorder %v232_v37, %v1604_v29  ;;  %vm401_vm15 = vcmp.eq.s32.totalorder %v231_v36, %v1623_v31 }
  0x58   : > { %1144 = vmatprep.subr.msk.bf16.mxu0 %vm1143_vm2, %v1356_v18  ;;  %vm1175_vm5 = vmpackc.low %vm398_vm14, %vm394_vm13  ;;  %vm403_vm13 = vcmp.eq.s32.totalorder %v232_v37, %v1614_v30  ;;  %vm405_vm2 = vcmp.eq.s32.totalorder %v232_v37, %v1623_v31 }
  0x59   : > { %1176 = vmatprep.subr.msk.bf16.mxu1 %vm1175_vm5, %v1356_v18  ;;  %vm1145_vm8 = vmpackc.low %vm395_vm1, %vm391_vm0  ;;  %vm408_vm1 = vcmp.eq.s32.totalorder %v233_v39, %v1595_v28  ;;  %vm412_vm5 = vcmp.eq.s32.totalorder %v234_v40, %v1595_v28 }
  0x5a   : > { %1146 = vmatpush1.bf16.msk.msra.mxu0 %vm1145_vm8, %v1356_v18  ;;  %vm1177_vm11 = vmpackc.low %vm397_vm4, %vm393_vm3  ;;  %vm410_vm4 = vcmp.eq.s32.totalorder %v233_v39, %v1604_v29  ;;  %vm414_vm8 = vcmp.eq.s32.totalorder %v234_v40, %v1604_v29 }
  0x5b   : > { %1178 = vmatpush1.bf16.msk.msra.mxu1 %vm1177_vm11, %v1356_v18  ;;  %vm1147_vm14 = vmpackc.low %vm404_vm7, %vm400_vm6  ;;  %vm407_vm7 = vcmp.eq.s32.totalorder %v233_v39, %v1614_v30  ;;  %vm411_vm11 = vcmp.eq.s32.totalorder %v234_v40, %v1614_v30 }
  0x5c   : > { %1148 = vmatprep.subr.msk.bf16.mxu0 %vm1147_vm14, %v1356_v18  ;;  %vm1179_vm0 = vmpackc.low %vm406_vm10, %vm402_vm9  ;;  %vm409_vm10 = vcmp.eq.s32.totalorder %v233_v39, %v1623_v31  ;;  %vm413_vm14 = vcmp.eq.s32.totalorder %v234_v40, %v1623_v31 }
  0x5d   : > { %1180 = vmatprep.subr.msk.bf16.mxu1 %vm1179_vm0, %v1356_v18  ;;  %vm1149_vm3 = vmpackc.low %vm403_vm13, %vm399_vm12 }
  0x5e   : > { %1150 = vmatpush1.bf16.msk.msra.mxu0 %vm1149_vm3, %v1356_v18  ;;  %vm1181_vm6 = vmpackc.low %vm405_vm2, %vm401_vm15  ;;  %vm886_vm2 = vcmp.lt.s32.totalorder %v218_v1, 512 }
  0x5f   : > { %1182 = vmatpush1.bf16.msk.msra.mxu1 %vm1181_vm6, %v1356_v18  ;;  %vm1151_vm9 = vmpackc.low %vm412_vm5, %vm408_vm1 }
  0x60   : > { %1152 = vmatprep.subr.msk.bf16.mxu0 %vm1151_vm9, %v1356_v18  ;;  %vm1183_vm12 = vmpackc.low %vm414_vm8, %vm410_vm4 }
  0x61   : > { %1184 = vmatprep.subr.msk.bf16.mxu1 %vm1183_vm12, %v1356_v18  ;;  %vm1153_vm13 = vmpackc.low %vm411_vm11, %vm407_vm7 }
  0x62   : > { %1154 = vmatpush1.bf16.msk.msra.mxu0 %vm1153_vm13, %v1356_v18  ;;  %vm1185_vm15 = vmpackc.low %vm413_vm14, %vm409_vm10 }
  0x63   : > { %1186 = vmatpush1.bf16.msk.msra.mxu1 %vm1185_vm15, %v1356_v18 }
  0x65   : > { %612 = vmatmul.mubr.f32.vlgmr.msra.gmra.mrb[0].mxu0 %v543_v41 }
  0x66   : > { %701 = vmatmul.mubr.f32.vlgmr.msra.gmra.mrb[0].mxu1 %v543_v41  ;;  %617 = vmatprep.mubr.f32.mxu0 %v1354_v2 }
  0x67   : > { %706 = vmatprep.mubr.f32.mxu1 %v1354_v2 }
  0x69   : > { %618 = vmatmul.mubr.f32.gmra.mrb[2].mxu0 %v544_v42 }
  0x6a   : > { %707 = vmatmul.mubr.f32.gmra.mrb[2].mxu1 %v544_v42  ;;  %623 = vmatprep.mubr.f32.mxu0 %v1354_v2 }
  0x6b   : > { %712 = vmatprep.mubr.f32.mxu1 %v1354_v2 }
  0x6d   : > { %624 = vmatmul.mubr.f32.gmra.mrb[4].mxu0 %v545_v43 }
  0x6e   : > { %713 = vmatmul.mubr.f32.gmra.mrb[4].mxu1 %v545_v43  ;;  %629 = vmatprep.mubr.f32.mxu0 %v1354_v2 }
  0x6f   : > { %718 = vmatprep.mubr.f32.mxu1 %v1354_v2 }
  0x71   : > { %630 = vmatmul.mubr.f32.gmra.mrb[6].mxu0 %v546_v44 }
  0x72   : > { %719 = vmatmul.mubr.f32.gmra.mrb[6].mxu1 %v546_v44 }
  0xbc   : > { %v748_v45 = vpop.permute.xlu0 %747  ;;  %v758_v8 = vpop.permute.xlu1 %757 }
  0xc0   : > { %v753_v58 = vpop.permute.xlu0 %752  ;;  %v763_v34 = vpop.permute.xlu1 %762 }
 0x138   : > { %v613_v46 = vpop.f32.mrb[0].mxu0 }
 0x139   : > { %v702_v47 = vpop.f32.mrb[0].mxu1  ;;  %v615_v48 = vpop.f32.mrb[1].mxu0  ;;  %v725_v50 = vmax.f32 %v613_v46, 0.0 }
 0x13a   : > { %v704_v49 = vpop.f32.mrb[1].mxu1  ;;  %v727_v51 = vmax.f32 %v702_v47, 0.0  ;;  %v726_v52 = vmax.f32 %v615_v48, 0.0 }
 0x13b   : > { %v728_v54 = vmax.f32 %v704_v49, 0.0  ;;  %v765_v62 = vmul.f32 %v748_v45, %v725_v50 }
 0x13c   : > { %v619_v53 = vpop.f32.mrb[2].mxu0  ;;  %v767_v2 = vmul.f32 %v748_v45, %v727_v51  ;;  %v766_v4 = vmul.f32 %v748_v45, %v726_v52 }
 0x13d   : > { %v729_v55 = vmax.f32 %v619_v53, 0.0  ;;  %v708_v56 = vpop.f32.mrb[2].mxu1  ;;  %v621_v57 = vpop.f32.mrb[3].mxu0  ;;  %v768_v10 = vmul.f32 %v748_v45, %v728_v54 }
 0x13e   : > { %v731_v59 = vmax.f32 %v708_v56, 0.0  ;;  %v730_v60 = vmax.f32 %v621_v57, 0.0  ;;  %v710_v61 = vpop.f32.mrb[3].mxu1 }
 0x13f   : > { %v769_v63 = vmul.f32 %v753_v58, %v729_v55  ;;  %v732_v0 = vmax.f32 %v710_v61, 0.0  ;;  %v821_v61 = vpop.permute.xlu0 %820 }
 0x140   : > { %v771_v5 = vmul.f32 %v753_v58, %v731_v59  ;;  %v770_v6 = vmul.f32 %v753_v58, %v730_v60  ;;  %v625_v9 = vpop.f32.mrb[4].mxu0 }
 0x141   : > { %v781_v11 = vadd.f32 %v769_v63, %v765_v62  ;;  %v772_v12 = vmul.f32 %v753_v58, %v732_v0  ;;  %v733_v13 = vmax.f32 %v625_v9, 0.0  ;;  %v714_v14 = vpop.f32.mrb[4].mxu1  ;;  %v627_v15 = vpop.f32.mrb[5].mxu0 }
 0x142   : > { %v799_v16 = vadd.f32 %v771_v5, %v767_v2  ;;  %v790_v17 = vadd.f32 %v770_v6, %v766_v4  ;;  %v735_v18 = vmax.f32 %v714_v14, 0.0  ;;  %v734_v19 = vmax.f32 %v627_v15, 0.0  ;;  %v716_v20 = vpop.f32.mrb[5].mxu1 }
 0x143   : > { %v808_v21 = vadd.f32 %v772_v12, %v768_v10  ;;  %v773_v22 = vmul.f32 %v758_v8, %v733_v13  ;;  %v736_v23 = vmax.f32 %v716_v20, 0.0  ;;  %v826_v6 = vrot.slane %v821_v61, %v1510_v7 }
 0x144   : > { %v775_v24 = vmul.f32 %v758_v8, %v735_v18  ;;  %v774_v25 = vmul.f32 %v758_v8, %v734_v19  ;;  %v631_v26 = vpop.f32.mrb[6].mxu0 }
 0x145   : > { %v782_v27 = vadd.f32 %v781_v11, %v773_v22  ;;  %v776_v28 = vmul.f32 %v758_v8, %v736_v23  ;;  %v737_v29 = vmax.f32 %v631_v26, 0.0  ;;  %v720_v30 = vpop.f32.mrb[6].mxu1  ;;  %v633_v31 = vpop.f32.mrb[7].mxu0 }
 0x146   : > { %v800_v32 = vadd.f32 %v799_v16, %v775_v24  ;;  %v791_v33 = vadd.f32 %v790_v17, %v774_v25  ;;  %v739_v35 = vmax.f32 %v720_v30, 0.0  ;;  %v738_v36 = vmax.f32 %v633_v31, 0.0  ;;  %v722_v37 = vpop.f32.mrb[7].mxu1 }
 0x147   : > { %v809_v38 = vadd.f32 %v808_v21, %v776_v28  ;;  %v777_v39 = vmul.f32 %v763_v34, %v737_v29  ;;  %v740_v40 = vmax.f32 %v722_v37, 0.0  ;;  %v1357_v28 = vmov 1966171168  }
 0x148   : > { %v779_v41 = vmul.f32 %v763_v34, %v739_v35  ;;  %v778_v42 = vmul.f32 %v763_v34, %v738_v36  ;;  %v862_v29 = vunpack.c.l.s4 %v1357_v28 }
 0x149   : > { %v783_v43 = vadd.f32 %v782_v27, %v777_v39  ;;  %v780_v44 = vmul.f32 %v763_v34, %v740_v40 }
 0x14a   : > { %v801_v45 = vadd.f32 %v800_v32, %v779_v41  ;;  %v792_v46 = vadd.f32 %v791_v33, %v778_v42  ;;  %v863_v30 = vunpack.c.0.s8 %v862_v29 }
 0x14b   : > { %v784_v47 = vrot.slane %v783_v43, 4  ;;  %v810_v48 = vadd.f32 %v809_v38, %v780_v44 }
 0x14c   : > { %v802_v49 = vrot.slane %v801_v45, 4  ;;  %v793_v50 = vrot.slane %v792_v46, 4  ;;  %v866_v33 = vsub.s32 %v863_v30, %v1505_v3 }
 0x14d   : > { %v785_v51 = vadd.f32 %v784_v47, %v783_v43  ;;  %v811_v52 = vrot.slane %v810_v48, 4 }
 0x14e   : > { %v803_v53 = vadd.f32 %v802_v49, %v801_v45  ;;  %v794_v54 = vadd.f32 %v793_v50, %v792_v46 }
 0x14f   : > { %v786_v55 = vrot.slane %v785_v51, 2  ;;  %v812_v56 = vadd.f32 %v811_v52, %v810_v48 }
 0x150   : > { %v804_v57 = vrot.slane %v803_v53, 2  ;;  %v795_v58 = vrot.slane %v794_v54, 2 }
 0x151   : > { %v787_v59 = vadd.f32 %v786_v55, %v785_v51  ;;  %v813_v60 = vrot.slane %v812_v56, 2 }
 0x152   : > { %v805_v62 = vadd.f32 %v804_v57, %v803_v53  ;;  %v796_v63 = vadd.f32 %v795_v58, %v794_v54 }
 0x153   : > { %v788_v0 = vrot.slane %v787_v59, 1  ;;  %v814_v2 = vadd.f32 %v813_v60, %v812_v56 }
 0x154   : > { %v806_v4 = vrot.slane %v805_v62, 1  ;;  %v797_v5 = vrot.slane %v796_v63, 1 }
 0x155   : > { %v789_v8 = vadd.f32 %v788_v0, %v787_v59  ;;  %v815_v9 = vrot.slane %v814_v2, 1 }
 0x156   : > { %v807_v10 = vadd.f32 %v806_v4, %v805_v62  ;;  %v798_v11 = vadd.f32 %v797_v5, %v796_v63 }
 0x157   : > { %v827_v12 = vadd.f32 %v826_v6, %v789_v8  ;;  %v816_v13 = vadd.f32 %v815_v9, %v814_v2 }
 0x158   : > { %v829_v14 = vadd.f32 %v826_v6, %v807_v10  ;;  %v828_v15 = vadd.f32 %v826_v6, %v798_v11 }
 0x159   : > { %v1112_v16 = vmul.f32 -1.442695, %v827_v12  ;;  %v830_v17 = vadd.f32 %v826_v6, %v816_v13 }
 0x15a   : > { %v1114_v18 = vmul.f32 -1.442695, %v829_v14  ;;  %v1113_v19 = vmul.f32 -1.442695, %v828_v15 }
 0x15b   : > { %1239 = vpow2.f32 %v1112_v16  ;;  %v1115_v20 = vmul.f32 -1.442695, %v830_v17 }
 0x15c   : > { %1241 = vpow2.f32 %v1114_v18 }
 0x15d   : > { %1243 = vpow2.f32 %v1113_v19 }
 0x15e   : > { %1245 = vpow2.f32 %v1115_v20 }
 0x165   : > { %v1240_v21 = vpop.eup %1239 }
 0x166   : > { %v1242_v22 = vpop.eup %1241  ;;  %v843_v7 = vadd.f32 1.0, %v1240_v21 }
 0x167   : > { %v1244_v23 = vpop.eup %1243  ;;  %v845_v24 = vadd.f32 1.0, %v1242_v22 }
 0x168   : > { %v1246_v25 = vpop.eup %1245  ;;  %1247 = vrcp.f32 %v843_v7  ;;  %v844_v26 = vadd.f32 1.0, %v1244_v23 }
 0x169   : > { %1249 = vrcp.f32 %v845_v24  ;;  %v846_v27 = vadd.f32 1.0, %v1246_v25 }
 0x16a   : > { %1251 = vrcp.f32 %v844_v26 }
 0x16b   : > { %1253 = vrcp.f32 %v846_v27 }
 0x172   : > { %v1248_v31 = vpop.eup %1247 }
 0x173   : > { %v1250_v32 = vpop.eup %1249 }
 0x174   : > { %v1252_v34 = vpop.eup %1251 }
 0x175   : > { %v1254_v35 = vpop.eup %1253  ;;  %v859_v36 = vcombine.low %v1248_v31, %v1252_v34 }
 0x176   : > { %v860_v37 = vcombine.low %v1250_v32, %v1254_v35 }
 0x177   : > { %v867_v38 = vrot.slane %v859_v36, %v866_v33 }
 0x178   : > { %v874_v39 = vrot.slane %v860_v37, %v866_v33 }
 0x17a   : > { %v875_v40 = vcombine.low %v867_v38, %v874_v39 }
 0x17c   : > { %v882_v41 = vrot.slane %v875_v40, %v866_v33 }
 0x17e   : > { %888 = vst.msk [vmem:[%s215_s9] sm:$0xf] %vm886_vm2, %v882_v41 }
 0x17f   : > { %1298 = shalt.err (!%p1295_p4)
}
 0x180   : > { %s1299_s7 = scalar_lea.hbm %s1731_s15, 64  ;;  %s1303_s5 = scalar_lea.hbm %s1779_s4, 128 }
 0x181   : > { %p1300_p5 = scmp.ne.s32.totalorder %s1731_s15, %s1299_s7  ;;  %p1304_p0 = scmp.lt.u32.totalorder %s1731_s15, %s1779_s4 }
 0x182   : > { %p1305_p1 = scmp.lt.u32.totalorder %s1303_s5, %s1299_s7  ;;  %p1307_p6 = scmp.lt.u32.totalorder %s1299_s7, %s1731_s15 }
 0x183   : > { %p1301_p8 = pnand %p1300_p5, %p1788_p11 }
 0x184   : > { %p1306_p3 = por %p1305_p1, %p1304_p0 }
 0x185   : > { %p1302_p9 = pneg %p1301_p8 }
 0x186   : > { %p1308_p12 = por %p1307_p6, %p1306_p3 }
 0x188   : > { %p1309_p13 = pnand %p1308_p12, %p1302_p9 }
 0x18a   : > { %1312 = shalt.err (!%p1309_p13)
}
 0x18b   : > { %1189 = dma.vmem_to_hbm [thread:$0]  (%p1788_p11), %s1733_s11, 64, %s1731_s15, %s890_s16  }
 0x18c PF: > { %s916_s10 = sand.u32 1, %s1339_s17   ;;  %p1789_p7 = scmp.ne.s32.totalorder %s1784_s29, 0 }
 0x18d   : > { %p1790_p10 = scmp.ge.s32.totalorder %s1351_s20, 2  ;;  %s917_s14 = scalar_lea.sflag [#allocation5], %s916_s10 }
 0x18f   : > { %p1196_p2 = pnand %p1790_p10, %p1789_p7 }
 0x191   : > { %1334 = dma.done.wait (!%p1196_p2), %s917_s14, 64  }
 0x192   : > { %1336 = vsyncadd (!%p1196_p2), %s917_s14, 4294967232  ;;  %p19_p4 = scmp.ge.s32.totalorder %s1412_s22, 4   ;;  %s1791_s17 = smov %s1343_s18 }
 0x193   : > { %s1792_s18 = smov %s1347_s19  ;;  %s1793_s19 = smov %s1424_s25 }
 0x194   : > { %s1794_s20 = smov %s1412_s22  ;;  %21 = sbr.rel (!%p19_p4) target bundleno = 8 (0x8), region = 82 }
 0x19b   :  { %922 = vsyncpa [#allocation4], 1 }
 0x19c   :  { %924 = vsyncpa [#allocation4 + $0x1], 1 }
 0x19d   :  { %925 = vsyncpa [#allocation5], 1 }
 0x19e   :  { %927 = vsyncpa [#allocation5 + $0x1], 1 }

</bundles_post_ra>
